<compile_context>
chip_gen: v7x
topology: tpu7x:2x2x1
jax: 0.10.0
libtpu: 0.0.40
codegen_flags: <defaults>
</compile_context>

<pallas_src>
import jax
import jax.numpy as jnp
from jax.experimental import pallas as pl
from jax.experimental.pallas import tpu as pltpu

IN_FEATURES = 28 * 28          # 784
OUT_FEATURES = 10
MAX_TILE_M = 4096              # rows per grid step (multiple of 16)


def _round_up(x, m):
    return ((x + m - 1) // m) * m


def _cdiv(a, b):
    return (a + b - 1) // b


def _choose_tile_m(m):
    """Pick the per-step row tile.

    Small batches: one tile rounded up to 16 rows (bf16 sublane packing).
    Larger batches: split into (at least) 2 steps so both v7x TensorCores
    get work, capped at MAX_TILE_M.
    """
    if m <= 256:
        return _round_up(m, 16)
    half = _round_up(_cdiv(m, 2), 16)
    return min(MAX_TILE_M, half)


def linear_kernel(x_ref, wt_ref, b_ref, o_ref):
    # x_ref:  (tile_m, 784) f32  -> cast to bf16 in-kernel (VPU, free: DMA-bound)
    # wt_ref: (784, 10)     bf16 (transposed weight)
    # b_ref:  (1, 10)       f32
    # o_ref:  (tile_m, 10)  f32
    x_bf = x_ref[...].astype(jnp.bfloat16)
    acc = jnp.dot(x_bf, wt_ref[...], preferred_element_type=jnp.float32)
    o_ref[...] = acc + b_ref[...]


def prepare_params(weight, bias):
    """Hoisted (once-per-parameter-set) weight/bias preparation.

    weight: (10, 784) f32, bias: (10,) f32.
    Returns wt: (784, 10) bf16, b2d: (1, 10) f32.
    """
    wt = weight.T.astype(jnp.bfloat16)
    b2d = bias.astype(jnp.float32).reshape(1, OUT_FEATURES)
    return wt, b2d


def model_forward(x, wt, b2d):
    """x: any shape with 784 trailing elements per row (e.g. (B, 1, 28, 28)).
    wt/b2d: outputs of prepare_params.  Returns (B, 10) float32."""
    x2d = x.reshape(-1, IN_FEATURES)
    m = x2d.shape[0]
    assert m > 0, "model_forward requires at least one row"

    tile_m = _choose_tile_m(m)
    grid = (_cdiv(m, tile_m),)

    cost = pl.CostEstimate(
        flops=2 * m * IN_FEATURES * OUT_FEATURES,
        transcendentals=0,
        bytes_accessed=(m * IN_FEATURES * 4            # x (f32)
                        + IN_FEATURES * OUT_FEATURES * 2  # w (bf16)
                        + OUT_FEATURES * 4             # bias
                        + m * OUT_FEATURES * 4),       # out (f32)
    )

    out = pl.pallas_call(
        linear_kernel,
        out_shape=jax.ShapeDtypeStruct((m, OUT_FEATURES), jnp.float32),
        grid=grid,
        in_specs=[
            pl.BlockSpec((tile_m, IN_FEATURES), lambda i: (i, 0)),
            pl.BlockSpec((IN_FEATURES, OUT_FEATURES), lambda i: (0, 0)),
            pl.BlockSpec((1, OUT_FEATURES), lambda i: (0, 0)),
        ],
        out_specs=pl.BlockSpec((tile_m, OUT_FEATURES), lambda i: (i, 0)),
        compiler_params=pltpu.CompilerParams(
            dimension_semantics=("parallel",),
            vmem_limit_bytes=48 * 1024 * 1024,
        ),
        cost_estimate=cost,
    )(x2d, wt, b2d)

    return out


def init_params(key):
    # Mimic torch.nn.Linear default init: U(-1/sqrt(fan_in), 1/sqrt(fan_in)).
    k_w, k_b = jax.random.split(key)
    bound = 1.0 / jnp.sqrt(jnp.float32(IN_FEATURES))
    weight = jax.random.uniform(k_w, (OUT_FEATURES, IN_FEATURES),
                                jnp.float32, -bound, bound)
    bias = jax.random.uniform(k_b, (OUT_FEATURES,), jnp.float32, -bound, bound)
    return weight, bias


if __name__ == "__main__":
    key = jax.random.PRNGKey(0)
    k_x, k_x2, k_p = jax.random.split(key, 3)
    weight, bias = init_params(k_p)
    wt, b2d = prepare_params(weight, bias)

    # Small MNIST-like NCHW input (B, 1, 28, 28).
    x = jax.random.normal(k_x, (2, 1, 28, 28), dtype=jnp.float32)
    out = jax.block_until_ready(model_forward(x, wt, b2d))
    ref = x.reshape(-1, IN_FEATURES) @ weight.T + bias
    assert out.shape == (2, OUT_FEATURES)
    assert jnp.allclose(out, ref, atol=2e-2, rtol=2e-2)

    # Ragged batch exercising the partial-last-block (masked) path.
    x2 = jax.random.normal(k_x2, (37, 1, 28, 28), dtype=jnp.float32)
    out2 = jax.block_until_ready(model_forward(x2, wt, b2d))
    ref2 = x2.reshape(-1, IN_FEATURES) @ weight.T + bias
    assert out2.shape == (37, OUT_FEATURES)
    assert jnp.allclose(out2, ref2, atol=2e-2, rtol=2e-2)

    print("KERNEL_OK")
</pallas_src>

<mosaic_0001>
module attributes {stable_mosaic.version = 11 : i64} {
  func.func @linear_kernel(%arg0: i32, %arg1: memref<16x784xf32, #tpu.memory_space<vmem>>, %arg2: memref<784x10xbf16, #tpu.memory_space<vmem>>, %arg3: memref<1x10xf32, #tpu.memory_space<vmem>>, %arg4: memref<16x10xf32, #tpu.memory_space<vmem>>) attributes {dimension_semantics = [#tpu.dimension_semantics<parallel>], iteration_bounds = array<i64: 1>, scalar_prefetch = 0 : i64, scratch_operands = 0 : i64, tpu.core_type = #tpu.core_type<tc>, window_params = [{transform_indices = @transform_0, window_bounds = array<i64: 16, 784>}, {pipeline_mode = #tpu.pipeline_mode<synchronous>, transform_indices = @transform_1, window_bounds = array<i64: 784, 10>}, {pipeline_mode = #tpu.pipeline_mode<synchronous>, transform_indices = @transform_2, window_bounds = array<i64: 1, 10>}, {transform_indices = @transform_3, window_bounds = array<i64: 16, 10>}]} {
    %c0 = arith.constant 0 : index
    %c0_0 = arith.constant 0 : index
    %0 = vector.load %arg1[%c0, %c0_0] : memref<16x784xf32, #tpu.memory_space<vmem>>, vector<16x784xf32>
    %1 = arith.truncf %0 : vector<16x784xf32> to vector<16x784xbf16>
    %c0_1 = arith.constant 0 : index
    %c0_2 = arith.constant 0 : index
    %2 = vector.load %arg2[%c0_1, %c0_2] : memref<784x10xbf16, #tpu.memory_space<vmem>>, vector<784x10xbf16>
    %cst = arith.constant dense<0.000000e+00> : vector<16x10xf32>
    %3 = tpu.matmul %1, %2, %cst {dimension_numbers = #tpu.dot_dimension_numbers<[1], [0], [0], [1], [0, 0, 1, 1], [], []>} : vector<16x784xbf16>, vector<784x10xbf16>, vector<16x10xf32> -> vector<16x10xf32>
    %c0_3 = arith.constant 0 : index
    %c0_4 = arith.constant 0 : index
    %4 = vector.load %arg3[%c0_3, %c0_4] : memref<1x10xf32, #tpu.memory_space<vmem>>, vector<1x10xf32>
    %5 = vector.broadcast %4 : vector<1x10xf32> to vector<16x10xf32>
    %6 = arith.addf %3, %5 : vector<16x10xf32>
    %c0_5 = arith.constant 0 : index
    %c0_6 = arith.constant 0 : index
    %7 = vector.load %arg4[%c0_5, %c0_6] : memref<16x10xf32, #tpu.memory_space<vmem>>, vector<16x10xf32>
    tpu.vector_store %arg4[%c0_5, %c0_6], %6 {strides = array<i32>} : memref<16x10xf32, #tpu.memory_space<vmem>>, vector<16x10xf32>,
    return
  }
  func.func @transform_0(%arg0: i32) -> (i32, i32) {
    %c0_i32 = arith.constant 0 : i32
    %c0_i32_0 = arith.constant 0 : i32
    return %arg0, %c0_i32 : i32, i32
  }
  func.func @transform_1(%arg0: i32) -> (i32, i32) {
    %c0_i32 = arith.constant 0 : i32
    %c0_i32_0 = arith.constant 0 : i32
    %c0_i32_1 = arith.constant 0 : i32
    return %c0_i32, %c0_i32_0 : i32, i32
  }
  func.func @transform_2(%arg0: i32) -> (i32, i32) {
    %c0_i32 = arith.constant 0 : i32
    %c0_i32_0 = arith.constant 0 : i32
    %c0_i32_1 = arith.constant 0 : i32
    return %c0_i32, %c0_i32_0 : i32, i32
  }
  func.func @transform_3(%arg0: i32) -> (i32, i32) {
    %c0_i32 = arith.constant 0 : i32
    %c0_i32_0 = arith.constant 0 : i32
    return %arg0, %c0_i32 : i32, i32
  }
}

</mosaic_0001>

<bundles_post_ra>
// kernel: tpu_custom_call.1
= control target key start
LH: loop header
LB: loop body
LE: loop exit
PB: predicated region body
PF: predicated region fallthrough
CT: control target
= control target key end

     0   :  { %8 = vsyncpa [#allocation3], 0  ;;  %v55_v28 = vlaneseq  ;;  %v1025_v32 = vmov 1983009808   ;;  %v1026_v53 = vmov 0.0   ;;  %vm1027_vm0 = vmmov 0   ;;  %s1279_s0 = inlined_call_operand.vmem [shape: f32[2,784], index: 0, kind: input, shape index: {}]   ;;  %s1280_s1 = inlined_call_operand.vmem [shape: bf16[784,10], index: 1, kind: input, shape index: {}]   ;;  %s1281_s2 = inlined_call_operand.vmem [shape: f32[1,10], index: 2, kind: input, shape index: {}]   ;;  %s1282_s3 = inlined_call_operand.hbm [shape: f32[2,10], index: 3, kind: output, shape index: {}]  }
   0x1   :  { %v928_v0 = vld [vmem:[%s1280_s1 + $0x40] sm:$0xff]   ;;  %v932_v4 = vld [vmem:[%s1280_s1 + $0x48] sm:$0xff]   ;;  %v936_v8 = vld [vmem:[%s1280_s1 + $0x50] sm:$0xff]   ;;  %v53_v33 = vunpack.c.l.s4 %v1025_v32  ;;  %vm610_vm1 = vcmask 130048   ;;  %vm778_vm2 = vcmask 80896  }
   0x2   :  { %v929_v1 = vld [vmem:[%s1280_s1] sm:$0xff]   ;;  %848 = vmatprep.subr.bf16.mxu0 %v928_v0  ;;  %v933_v5 = vld [vmem:[%s1280_s1 + $0x8] sm:$0xff]   ;;  %v937_v9 = vld [vmem:[%s1280_s1 + $0x10] sm:$0xff]   ;;  %v56_v34 = vshrl.u32 %v55_v28, 7 }
   0x3   :  { %v930_v2 = vld [vmem:[%s1280_s1 + $0xc0] sm:$0xff]   ;;  %849 = vmatpush3.bf16.msra.mxu0 %v929_v1  ;;  %v934_v6 = vld [vmem:[%s1280_s1 + $0xc8] sm:$0xff]   ;;  %v938_v10 = vld [vmem:[%s1280_s1 + $0xd0] sm:$0xff]   ;;  %v54_v37 = vunpack.c.0.s8 %v53_v33 }
   0x4   :  { %v931_v3 = vld [vmem:[%s1280_s1 + $0x80] sm:$0xff]   ;;  %870 = vmatprep.subr.bf16.mxu1 %v930_v2  ;;  %850 = vmatprep.subr.bf16.mxu0 %v932_v4  ;;  %v935_v7 = vld [vmem:[%s1280_s1 + $0x88] sm:$0xff]   ;;  %v939_v11 = vld [vmem:[%s1280_s1 + $0x90] sm:$0xff]  }
   0x5   :  { %871 = vmatpush3.bf16.msra.mxu1 %v931_v3  ;;  %v940_v12 = vld [vmem:[%s1280_s1 + $0x58] sm:$0xff]   ;;  %v944_v16 = vld [vmem:[%s1280_s1 + $0x60] sm:$0xff]   ;;  %v948_v20 = vld [vmem:[%s1280_s1 + $0x68] sm:$0xff]   ;;  %v1156_v40 = vsub.s32 %v54_v37, %v56_v34 }
   0x6   :  { %872 = vmatprep.subr.bf16.mxu1 %v934_v6  ;;  %v941_v13 = vld [vmem:[%s1280_s1 + $0x18] sm:$0xff]   ;;  %v945_v17 = vld [vmem:[%s1280_s1 + $0x20] sm:$0xff]   ;;  %v949_v21 = vld [vmem:[%s1280_s1 + $0x28] sm:$0xff]  }
   0x7   :  { %851 = vmatpush3.bf16.msra.mxu0 %v933_v5  ;;  %v942_v14 = vld [vmem:[%s1280_s1 + $0xd8] sm:$0xff]   ;;  %v946_v18 = vld [vmem:[%s1280_s1 + $0xe0] sm:$0xff]   ;;  %v950_v22 = vld [vmem:[%s1280_s1 + $0xe8] sm:$0xff]  }
   0x8   :  { %852 = vmatprep.subr.bf16.mxu0 %v936_v8  ;;  %v943_v15 = vld [vmem:[%s1280_s1 + $0x98] sm:$0xff]   ;;  %v947_v19 = vld [vmem:[%s1280_s1 + $0xa0] sm:$0xff]   ;;  %v951_v23 = vld [vmem:[%s1280_s1 + $0xa8] sm:$0xff]  }
   0x9   :  { %873 = vmatpush3.bf16.msra.mxu1 %v935_v7  ;;  %v952_v24 = vld [vmem:[%s1280_s1 + $0x70] sm:$0xff]   ;;  %v956_v29 = vld [vmem:[%s1280_s1 + $0x78] sm:$0xff]   ;;  %v968_v42 = vld [vmem:[%s1280_s1 + $0x140] sm:$0xff]  }
   0xa   :  { %874 = vmatprep.subr.bf16.mxu1 %v938_v10  ;;  %v953_v25 = vld [vmem:[%s1280_s1 + $0x30] sm:$0xff]   ;;  %v957_v30 = vld [vmem:[%s1280_s1 + $0x38] sm:$0xff]   ;;  %v973_v0 = vld [vmem:[%s1280_s1 + $0x100] sm:$0xff]  }
   0xb   :  { %853 = vmatpush3.bf16.msra.mxu0 %v937_v9  ;;  %v954_v26 = vld [vmem:[%s1280_s1 + $0xf0] sm:$0xff]   ;;  %v958_v31 = vld [vmem:[%s1280_s1 + $0xf8] sm:$0xff]   ;;  %v974_v3 = vld [vmem:[%s1280_s1 + $0x148] sm:$0xff]  }
   0xc   :  { %854 = vmatprep.subr.bf16.mxu0 %v940_v12  ;;  %v955_v27 = vld [vmem:[%s1280_s1 + $0xb0] sm:$0xff]   ;;  %v961_v36 = vld [vmem:[%s1279_s0 + $0x1c] ss:$14 sps:$4 sm:$0xff]   ;;  %v963_v38 = vld [vmem:[%s1279_s0 + $0x38] ss:$14 sps:$4 sm:$0xff]  }
   0xd   :  { %875 = vmatpush3.bf16.msra.mxu1 %v939_v11  ;;  %v959_v35 = vld [vmem:[%s1279_s0] ss:$14 sps:$4 sm:$0xff]   ;;  %v967_v41 = vld [vmem:[%s1280_s1 + $0xb8] sm:$0xff]   ;;  %v969_v43 = vld [vmem:[%s1279_s0 + $0x4] ss:$14 sps:$4 sm:$0xff]   ;;  %v72_v46 = vrot.slane %v961_v36, %v1156_v40  ;;  %v129_v47 = vrot.slane %v963_v38, %v1156_v40 }
   0xe   :  { %876 = vmatprep.subr.bf16.mxu1 %v942_v14  ;;  %v965_v39 = vld [vmem:[%s1279_s0 + $0x54] ss:$14 sps:$4 sm:$0xff]   ;;  %v58_v45 = vrot.slane %v959_v35, %v1156_v40  ;;  %v971_v49 = vld [vmem:[%s1279_s0 + $0x3c] ss:$14 sps:$4 sm:$0xff]   ;;  %v972_v50 = vld [vmem:[%s1279_s0 + $0x58] ss:$14 sps:$4 sm:$0xff]   ;;  %v65_v51 = vrot.slane %v969_v43, %v1156_v40 }
   0xf   :  { %855 = vmatpush3.bf16.msra.mxu0 %v941_v13  ;;  %v970_v44 = vld [vmem:[%s1279_s0 + $0x20] ss:$14 sps:$4 sm:$0xff]   ;;  %v143_v48 = vrot.slane %v965_v39, %v1156_v40  ;;  %v136_v59 = vrot.slane %v971_v49, %v1156_v40  ;;  %v150_v60 = vrot.slane %v972_v50, %v1156_v40  ;;  %v978_v9 = vld [vmem:[%s1280_s1 + $0x158] sm:$0xff]  }
  0x10   :  { %856 = vmatprep.subr.bf16.mxu0 %v944_v16  ;;  %v79_v52 = vrot.slane %v970_v44, %v1156_v40  ;;  %v81_v54 = vcombine.high %v58_v45, %v72_v46  ;;  %v80_v56 = vcombine.low %v58_v45, %v72_v46  ;;  %v975_v6 = vld [vmem:[%s1280_s1 + $0x108] sm:$0xff]   ;;  %v976_v7 = vld [vmem:[%s1280_s1 + $0x150] sm:$0xff]   ;;  %v979_v10 = vld [vmem:[%s1280_s1 + $0x118] sm:$0xff]  }
  0x11   :  { %877 = vmatpush3.bf16.msra.mxu1 %v943_v15  ;;  %v152_v55 = vcombine.high %v129_v47, %v143_v48  ;;  %v151_v57 = vcombine.low %v129_v47, %v143_v48  ;;  %v154_v1 = vcombine.high %v136_v59, %v150_v60  ;;  %v153_v2 = vcombine.low %v136_v59, %v150_v60  ;;  %v977_v8 = vld [vmem:[%s1280_s1 + $0x110] sm:$0xff]   ;;  %v980_v11 = vld [vmem:[%s1280_s1 + $0x160] sm:$0xff]   ;;  %v991_v16 = vld [vmem:[%s1279_s0 + $0xc] ss:$14 sps:$4 sm:$0x33]  }
  0x12   :  { %878 = vmatprep.subr.bf16.mxu1 %v946_v18  ;;  %v83_v58 = vcombine.high %v65_v51, %v79_v52  ;;  %v82_v61 = vcombine.low %v65_v51, %v79_v52  ;;  %v988_v12 = vld [vmem:[%s1280_s1 + $0x180] sm:$0xff]   ;;  %v989_v14 = vld [vmem:[%s1279_s0 + $0x8] ss:$14 sps:$4 sm:$0xff]  }
  0x13   :  { %857 = vmatpush3.bf16.msra.mxu0 %v945_v17  ;;  %v205_v62 = vpack.c.bf16 %v152_v55, %v81_v54  ;;  %v204_v63 = vpack.c.bf16 %v151_v57, %v80_v56  ;;  %v981_v13 = vld [vmem:[%s1280_s1 + $0x120] sm:$0xff]   ;;  %v994_v17 = vld [vmem:[%s1279_s0 + $0x28] ss:$14 sps:$4 sm:$0x33]   ;;  %v987_v43 = vld [vmem:[%s1280_s1 + $0x138] sm:$0xff]  }
  0x14   :  { %858 = vmatprep.subr.bf16.mxu0 %v948_v20  ;;  %v207_v4 = vpack.c.bf16 %v154_v1, %v83_v58  ;;  %v206_v5 = vpack.c.bf16 %v153_v2, %v82_v61  ;;  %v992_v15 = vld [vmem:[%s1279_s0 + $0x24] ss:$14 sps:$4 sm:$0xff]   ;;  %v982_v18 = vld [vmem:[%s1280_s1 + $0x168] sm:$0xff]   ;;  %v797_v46 = vld [vmem:[%s1281_s2] ss:$0 sm:$0xff] }
  0x15   :  { %879 = vmatpush3.bf16.msra.mxu1 %v947_v19  ;;  %646 = vmatprep.mubr.bf16.mxu0 %v205_v62  ;;  %v94_v19 = vrot.slane %v989_v14, %v1156_v40  ;;  %v108_v20 = vrot.slane %v992_v15, %v1156_v40  ;;  %v984_v34 = vld [vmem:[%s1280_s1 + $0x170] sm:$0xff]  }
  0x16   :  { %880 = vmatprep.subr.bf16.mxu1 %v950_v22  ;;  %687 = vmatprep.mubr.bf16.mxu1 %v207_v4  ;;  %v997_v22 = vld [vmem:[%s1279_s0 + $0x44] ss:$14 sps:$4 sm:$0x33]  }
  0x17   :  { %859 = vmatpush3.bf16.msra.mxu0 %v949_v21  ;;  %v995_v21 = vld [vmem:[%s1279_s0 + $0x40] ss:$14 sps:$4 sm:$0xff]   ;;  %v172_v28 = vrot.slane %v997_v22, %v1156_v40 }
  0x18   :  { %860 = vmatprep.subr.bf16.mxu0 %v952_v24  ;;  %v115_v24 = vrot.slane %v994_v17, %v1156_v40  ;;  %v985_v37 = vld [vmem:[%s1280_s1 + $0x130] sm:$0xff]  }
  0x19   :  { %881 = vmatpush3.bf16.msra.mxu1 %v951_v23  ;;  %v101_v23 = vrot.slane %v991_v16, %v1156_v40 }
  0x1a   :  { %882 = vmatprep.subr.bf16.mxu1 %v954_v26  ;;  %v1000_v26 = vld [vmem:[%s1279_s0 + $0x60] ss:$14 sps:$4 sm:$0x33]  }
  0x1b   :  { %861 = vmatpush3.bf16.msra.mxu0 %v953_v25  ;;  %v998_v25 = vld [vmem:[%s1279_s0 + $0x5c] ss:$14 sps:$4 sm:$0xff]   ;;  %v186_v32 = vrot.slane %v1000_v26, %v1156_v40  ;;  %v118_v33 = vcombine.low %v101_v23, %v115_v24 }
  0x1c   :  { %862 = vmatprep.subr.bf16.mxu0 %v956_v29  ;;  %v983_v29 = vld [vmem:[%s1280_s1 + $0x128] sm:$0xff]  }
  0x1d   :  { %883 = vmatpush3.bf16.msra.mxu1 %v955_v27  ;;  %v165_v27 = vrot.slane %v995_v21, %v1156_v40  ;;  %v189_v36 = vcombine.low %v172_v28, %v186_v32 }
  0x1e   :  { %884 = vmatprep.subr.bf16.mxu1 %v958_v31  ;;  %v179_v31 = vrot.slane %v998_v25, %v1156_v40  ;;  %v986_v40 = vld [vmem:[%s1280_s1 + $0x178] sm:$0xff]  }
  0x1f   :  { %863 = vmatpush3.bf16.msra.mxu0 %v957_v30  ;;  %v117_v30 = vcombine.high %v94_v19, %v108_v20  ;;  %v210_v39 = vpack.c.bf16 %v189_v36, %v118_v33 }
  0x20   :  { %892 = vmatprep.subr.bf16.mxu0 %v968_v42  ;;  %v188_v35 = vcombine.high %v165_v27, %v179_v31  ;;  %v187_v42 = vcombine.low %v165_v27, %v179_v31 }
  0x21   :  { %885 = vmatpush3.bf16.msra.mxu1 %v967_v41  ;;  %v116_v41 = vcombine.low %v94_v19, %v108_v20 }
  0x22   :  { %916 = vmatprep.subr.bf16.mxu1 %v1026_v53  ;;  %647 = vmatmul.mubr.bf16.vlgmr.msra.gmra.mrb[0].mxu0 %v204_v63  ;;  %v209_v38 = vpack.c.bf16 %v188_v35, %v117_v30 }
  0x23   :  { %893 = vmatpush3.bf16.msra.mxu0 %v973_v0  ;;  %v208_v44 = vpack.c.bf16 %v187_v42, %v116_v41 }
  0x24   :  { %894 = vmatprep.subr.bf16.mxu0 %v974_v3  ;;  %688 = vmatmul.mubr.bf16.vlgmr.msra.gmra.mrb[0].mxu1 %v206_v5 }
  0x25   :  { %918 = vmatprep.mubr.msk.bf16.mxu1 %vm1027_vm0, %v1026_v53  ;;  %917 = vmatpush3.bf16.msra.mxu1 %v988_v12 }
  0x26   :  { %728 = vmatprep.mubr.bf16.mxu0 %v209_v38 }
  0x27   :  { %895 = vmatpush3.bf16.msra.mxu0 %v975_v6 }
  0x28   :  { %896 = vmatprep.subr.bf16.mxu0 %v976_v7 }
  0x2b   :  { %897 = vmatpush3.bf16.msra.mxu0 %v977_v8 }
  0x2c   :  { %898 = vmatprep.subr.bf16.mxu0 %v978_v9  ;;  %919 = vmatmul.mubr.msk.bf16.vlgmr.msra.gmra.mrb[4].mxu1 %vm610_vm1, %v210_v39 }
  0x2f   :  { %899 = vmatpush3.bf16.msra.mxu0 %v979_v10 }
  0x30   :  { %900 = vmatprep.subr.bf16.mxu0 %v980_v11 }
  0x33   :  { %901 = vmatpush3.bf16.msra.mxu0 %v981_v13 }
  0x34   :  { %902 = vmatprep.subr.bf16.mxu0 %v982_v18 }
  0x37   :  { %903 = vmatpush3.bf16.msra.mxu0 %v983_v29 }
  0x38   :  { %904 = vmatprep.subr.bf16.mxu0 %v984_v34 }
  0x3b   :  { %905 = vmatpush3.bf16.msra.mxu0 %v985_v37 }
  0x3c   :  { %906 = vmatprep.subr.bf16.mxu0 %v986_v40 }
  0x3f   :  { %907 = vmatpush3.bf16.msra.mxu0 %v987_v43 }
  0x42   :  { %729 = vmatmul.mubr.bf16.vlgmr.msra.gmra.mrb[4].mxu0 %v208_v44 }
  0xf5   :  { %v864_v45 = vpop.f32.mrb[0].mxu0 }
  0xf6   :  { %v865_v47 = vpop.f32.mrb[1].mxu0 }
  0xf7   :  { %v866_v48 = vadd.f32 %v865_v47, %v864_v45  ;;  %v867_v49 = vpop.f32.mrb[2].mxu0  ;;  %v886_v50 = vpop.f32.mrb[0].mxu1 }
  0xf8   :  { %v868_v51 = vpop.f32.mrb[3].mxu0  ;;  %v887_v54 = vpop.f32.mrb[1].mxu1 }
  0xf9   :  { %v649_v52 = vadd.f32 %v866_v48, %v797_v46  ;;  %v869_v53 = vadd.f32 %v868_v51, %v867_v49  ;;  %v888_v55 = vadd.f32 %v887_v54, %v886_v50  ;;  %v889_v56 = vpop.f32.mrb[2].mxu1 }
  0xfa   :  { %v890_v58 = vpop.f32.mrb[3].mxu1 }
  0xfb   :  { %v652_v57 = vadd.f32 %v869_v53, %v797_v46  ;;  %v690_v59 = vadd.f32 %v888_v55, %v649_v52  ;;  %v891_v60 = vadd.f32 %v890_v58, %v889_v56 }
  0xfd   :  { %v693_v61 = vadd.f32 %v891_v60, %v652_v57 }
  0xff   :  { %v771_v62 = vpop.f32.mrb[4].mxu1 }
 0x100   :  { %v920_v63 = vpop.f32.mrb[5].mxu1 }
 0x101   :  { %v774_v0 = vpop.f32.mrb[6].mxu1 }
 0x102   :  { %v921_v1 = vpop.f32.mrb[7].mxu1 }
 0x115   :  { %v908_v2 = vpop.f32.mrb[4].mxu0 }
 0x116   :  { %v909_v3 = vpop.f32.mrb[5].mxu0 }
 0x117   :  { %v910_v4 = vadd.f32 %v909_v3, %v908_v2  ;;  %v911_v5 = vpop.f32.mrb[6].mxu0 }
 0x118   :  { %v912_v6 = vpop.f32.mrb[7].mxu0 }
 0x119   :  { %v731_v7 = vadd.f32 %v910_v4, %v690_v59  ;;  %v913_v8 = vadd.f32 %v912_v6, %v911_v5 }
 0x11b   :  { %v772_v9 = vadd.f32 %v771_v62, %v731_v7  ;;  %v734_v10 = vadd.f32 %v913_v8, %v693_v61 }
 0x11d   :  { %779 = vst.msk [vmem:[#allocation2] sm:$0xff] %vm778_vm2, %v772_v9  ;;  %v775_v11 = vadd.f32 %v774_v0, %v734_v10 }
 0x11f   :  { %780 = vst.msk [vmem:[#allocation2 + $0x8] sm:$0xff] %vm778_vm2, %v775_v11 }
 0x120   :  { %785 = vsyncadd [#allocation3], 224  ;;  %s1028_s1 = smov [#allocation2]  }
 0x121   :  { %s786_s2 = sshll.u32 %s1028_s1, 4  ;;  %s787_s2 = int_to_ptr.vmem [resolvable:$true] %s786_s2 }
 0x122   :  { %s1001_s8 = scalar_lea.vmem %s787_s2, 32  ;;  %s1005_s9 = scalar_lea.vmem %s787_s2, 256 }
 0x123   :  { %p1002_p0 = scmp.ne.s32.totalorder %s787_s2, %s1001_s8  ;;  %p1006_p1 = scmp.lt.s32.totalorder %s787_s2, %s787_s2 }
 0x124   :  { %p1007_p2 = scmp.lt.s32.totalorder %s1005_s9, %s1001_s8 }
 0x126   :  { %p1008_p3 = por %p1007_p2, %p1006_p1 }
 0x128   :  { %p1009_p4 = pnand %p1008_p3, %p1002_p0 }
 0x12a   :  { %1012 = shalt.err (!%p1009_p4)
}
 0x12b   :  { %s1013_s12 = scalar_lea.hbm %s1282_s3, 32 }
 0x12c   :  { %p1014_p5 = scmp.ne.s32.totalorder %s1282_s3, %s1013_s12  ;;  %p1017_p6 = scmp.lt.u32.totalorder %s1013_s12, %s1282_s3 }
 0x12e   :  { %p1019_p7 = pnand %p1017_p6, %p1014_p5 }
 0x130   :  { %1022 = shalt.err (!%p1019_p7)
}
 0x131   :  { %s1029_s17 = smov 32   ;;  %s1030_s18 = smov 2  }
 0x132   :  { %792 = dma.vmem_to_hbm [thread:$0]  %s787_s2, 32, %s1282_s3, [#allocation3], %s1029_s17, %s1029_s17, %s1030_s18  }
 0x133   :  { %1023 = dma.done.wait [#allocation3], 256  }
 0x134   :  { %1024 = vsyncadd [#allocation3], 4294967040 }
 0x135   :  { %796 = vsyncpa [#allocation3], 1 }

</bundles_post_ra>
